<compile_context>
chip_gen: v7x
topology: tpu7x:2x2x1
jax: 0.10.0
libtpu: 0.0.40
codegen_flags: <defaults>
</compile_context>

<pallas_src>
import functools

import jax
import jax.numpy as jnp
from jax.experimental import pallas as pl
from jax.experimental.pallas import tpu as pltpu


def _round_width(width, multiplier, min_width=8, divisor=8):
    """Mirror of SE._round_width from the PyTorch module."""
    if not multiplier:
        return width
    width *= multiplier
    min_width = min_width or divisor
    width_out = max(min_width, int(width + divisor / 2) // divisor * divisor)
    if width_out < 0.9 * width:
        width_out += divisor
    return int(width_out)


# ---------------------- generation-aware VMEM budgets ------------------------

def _vmem_budgets():
    """Returns (block_budget, vmem_limit_cap) in bytes from physical VMEM."""
    cap = 64 << 20                      # conservative default (v7x per-TC)
    try:
        info = pltpu.get_tpu_info()
        cap = int(getattr(info, "vmem_capacity_bytes", cap)) or cap
    except Exception:
        pass
    if cap >= (96 << 20):               # v5e / v6e: 128 MiB per TensorCore
        return int(cap * 0.70), int(cap * 0.85)
    # v7x: 64 MiB per TensorCore -- stay well under physical for compiler scratch
    return int(cap * 0.45), int(cap * 0.75)


def _vmem_limit(need_bytes, limit_cap):
    need = int(need_bytes) + (4 << 20)  # headroom for compiler internal scratch
    return int(min(limit_cap, max(need, 16 << 20)))


def _pick_batch_tile(B, C, S, itemsize, block_budget):
    """Divisor-of-B batch tile: moderate (~4 MiB) blocks, >= 4 grid steps
    (>= 2 as fallback) so pipelining and both v7x TensorCores stay busy.
    Returns None if even one batch element is too big (two-phase fallback)."""
    per_b = C * S * itemsize                         # one buffer, one batch elem
    if 5 * per_b > block_budget:                     # 2x in + 2x out + temps
        return None
    target_block = 4 << 20                           # ~4 MiB hits HBM roofline
    max_bt = min(B,
                 max(1, block_budget // (5 * per_b)),
                 max(1, target_block // per_b))
    divisors = [d for d in range(1, B + 1) if B % d == 0 and d <= max_bt]
    for min_steps in (4, 2):
        pref = [d for d in divisors if B // d >= min_steps]
        if pref:
            return max(pref)
    return max(divisors)


# ----------------------- fused single-pass kernel ---------------------------

def _se_fused_kernel(x_ref, wa_ref, b1_ref, wb_ref, b2_ref, o_ref, *, use_mxu):
    # x_ref: (bt, C, S) slab for this grid step.  Weights are f32:
    #   use_mxu=True : wa = w1.T (C, Cfc), wb = w2.T (Cfc, C)
    #   use_mxu=False: wa = w1   (Cfc, C), wb = w2   (C, Cfc)
    inv_s = jnp.float32(1.0 / x_ref.shape[-1])

    # Squeeze: mean over the flattened spatial axis with f32 accumulation.
    # (No slab-wide astype -- the big tile stays in its native dtype.)
    pooled = jnp.sum(x_ref[...], axis=-1, dtype=jnp.float32) * inv_s       # (bt, C)

    # Excitation: tiny FC chain in f32.  MXU for real X3D stages (C >= 128),
    # VPU broadcast-multiply + lane reduce for tiny C (avoids MXU push/pop).
    if use_mxu:
        h = jnp.dot(pooled, wa_ref[...], preferred_element_type=jnp.float32)
    else:
        h = jnp.sum(wa_ref[...][None, :, :] * pooled[:, None, :], axis=-1)  # (bt, Cfc)
    h = jnp.maximum(h + b1_ref[...], 0.0)
    if use_mxu:
        s = jnp.dot(h, wb_ref[...], preferred_element_type=jnp.float32)
    else:
        s = jnp.sum(wb_ref[...][None, :, :] * h[:, None, :], axis=-1)       # (bt, C)
    s = jax.nn.sigmoid(s + b2_ref[...])

    # Scale: stays in x's dtype (scale vector cast down, not the slab up).
    o_ref[...] = (x_ref[...] * s.astype(x_ref.dtype)[:, :, None]).astype(o_ref.dtype)


# ------------------ two-phase fallback for very large C*S -------------------

def _pool_sum_kernel(x_ref, sum_ref, *, valid_s, tile_s):
    sj = pl.program_id(1)
    n_s = pl.num_programs(1)

    @pl.when(sj == 0)
    def _init():
        sum_ref[...] = jnp.zeros_like(sum_ref)

    def _partial_sum(x):
        return jnp.sum(x, axis=-1, dtype=jnp.float32)[:, :, None]          # (1, C, 1)

    if valid_s % tile_s != 0:
        # Only the last S tile is ragged -- mask it there and nowhere else.
        @pl.when(sj == n_s - 1)
        def _last():
            lane = jax.lax.broadcasted_iota(jnp.int32, x_ref.shape, dimension=2)
            mask = (sj * tile_s + lane) < valid_s
            sum_ref[...] += _partial_sum(
                jnp.where(mask, x_ref[...], jnp.zeros_like(x_ref[...])))

        @pl.when(sj != n_s - 1)
        def _full():
            sum_ref[...] += _partial_sum(x_ref[...])
    else:
        sum_ref[...] += _partial_sum(x_ref[...])


def _scale_kernel(x_ref, s_ref, o_ref):
    o_ref[...] = (x_ref[...] * s_ref[...]).astype(o_ref.dtype)


# --------------------------------- wrapper ----------------------------------

def se_forward(x, w1, b1, w2, b2):
    """x: (B, C, D, H, W); weights are squeezed Conv3d 1x1x1 params:
    w1: (Cfc, C), b1: (Cfc,), w2: (C, Cfc), b2: (C,)."""
    B, C, D, H, W = x.shape
    S = D * H * W
    Cfc = w1.shape[0]
    itemsize = jnp.dtype(x.dtype).itemsize
    x2 = x.reshape(B, C, S)

    use_mxu = C >= 128
    if use_mxu:
        wa = w1.astype(jnp.float32).T            # (C, Cfc)
        wb = w2.astype(jnp.float32).T            # (Cfc, C)
    else:
        wa = w1.astype(jnp.float32)              # (Cfc, C)
        wb = w2.astype(jnp.float32)              # (C, Cfc)
    b1r = b1.astype(jnp.float32).reshape(1, Cfc)
    b2r = b2.astype(jnp.float32).reshape(1, C)
    w_bytes = 4 * (2 * C * Cfc + C + Cfc)

    block_budget, limit_cap = _vmem_budgets()
    bt = _pick_batch_tile(B, C, S, itemsize, block_budget)

    if bt is not None:
        # Fused single pass over HBM: pool + FC chain + scale per (bt, C, S) slab.
        block_bytes = 4 * bt * C * S * itemsize          # 2x in + 2x out buffers
        out = pl.pallas_call(
            functools.partial(_se_fused_kernel, use_mxu=use_mxu),
            out_shape=jax.ShapeDtypeStruct((B, C, S), x.dtype),
            grid_spec=pltpu.PrefetchScalarGridSpec(
                num_scalar_prefetch=0,
                grid=(B // bt,),
                in_specs=[
                    pl.BlockSpec((bt, C, S), lambda b: (b, 0, 0)),
                    pl.BlockSpec(wa.shape, lambda b: (0, 0)),
                    pl.BlockSpec((1, Cfc), lambda b: (0, 0)),
                    pl.BlockSpec(wb.shape, lambda b: (0, 0)),
                    pl.BlockSpec((1, C), lambda b: (0, 0)),
                ],
                out_specs=pl.BlockSpec((bt, C, S), lambda b: (b, 0, 0)),
            ),
            compiler_params=pltpu.CompilerParams(
                dimension_semantics=("parallel",),
                vmem_limit_bytes=_vmem_limit(block_bytes + 4 * w_bytes, limit_cap)),
            # NOTE: no input_output_aliases -- aliasing makes XLA insert a
            # defensive copy of x (an extra HBM pass) whenever x is not donated.
        )(x2, wa, b1r, wb, b2r)
        return out.reshape(B, C, D, H, W)

    # ---- S-tiled two-phase fallback: even a single-batch slab exceeds VMEM ----
    tile_s = (block_budget // (C * itemsize * 5)) // 128 * 128
    tile_s = int(max(128, tile_s))
    tile_s = min(tile_s, S)
    n_s = pl.cdiv(S, tile_s)

    # Phase 1: per-(b, c) spatial sums, accumulated across S tiles.
    sums = pl.pallas_call(
        functools.partial(_pool_sum_kernel, valid_s=S, tile_s=tile_s),
        out_shape=jax.ShapeDtypeStruct((B, C, 1), jnp.float32),
        grid_spec=pltpu.PrefetchScalarGridSpec(
            num_scalar_prefetch=0,
            grid=(B, n_s),
            in_specs=[pl.BlockSpec((1, C, tile_s), lambda b, sj: (b, 0, sj))],
            out_specs=pl.BlockSpec((1, C, 1), lambda b, sj: (b, 0, 0)),
        ),
        compiler_params=pltpu.CompilerParams(
            dimension_semantics=("parallel", "arbitrary"),
            vmem_limit_bytes=_vmem_limit(2 * C * tile_s * itemsize, limit_cap)),
    )(x2)

    # Tiny FC chain on the pooled vector in plain JAX (negligible work).
    pooled = sums[:, :, 0] * jnp.float32(1.0 / S)                          # (B, C)
    h = jnp.maximum(pooled @ w1.astype(jnp.float32).T + b1r, 0.0)
    sc = jax.nn.sigmoid(h @ w2.astype(jnp.float32).T + b2r)               # (B, C)
    sc3 = sc.astype(x.dtype)[:, :, None]                                   # (B, C, 1)

    # Phase 2: elementwise scale, tiled over S, in x's native dtype.
    out = pl.pallas_call(
        _scale_kernel,
        out_shape=jax.ShapeDtypeStruct((B, C, S), x.dtype),
        grid_spec=pltpu.PrefetchScalarGridSpec(
            num_scalar_prefetch=0,
            grid=(B, n_s),
            in_specs=[
                pl.BlockSpec((1, C, tile_s), lambda b, sj: (b, 0, sj)),
                pl.BlockSpec((1, C, 1), lambda b, sj: (b, 0, 0)),
            ],
            out_specs=pl.BlockSpec((1, C, tile_s), lambda b, sj: (b, 0, sj)),
        ),
        compiler_params=pltpu.CompilerParams(
            dimension_semantics=("parallel", "parallel"),
            vmem_limit_bytes=_vmem_limit(4 * C * tile_s * itemsize, limit_cap)),
    )(x2, sc3)
    return out.reshape(B, C, D, H, W)


def se_reference(x, w1, b1, w2, b2):
    """Pure-JAX reference matching the PyTorch SE semantics."""
    pooled = jnp.mean(x, axis=(2, 3, 4))                                   # (B, C)
    h = jnp.maximum(pooled @ w1.T + b1, 0.0)                               # (B, Cfc)
    s = jax.nn.sigmoid(h @ w2.T + b2)                                      # (B, C)
    return x * s[:, :, None, None, None]


if __name__ == "__main__":
    # Small shapes consistent with the module; S = D*H*W = 128 (lane-dense).
    B, C, D, H, W = 2, 16, 2, 8, 8
    ratio = 0.25
    Cfc = _round_width(C, ratio)   # -> 8

    key = jax.random.PRNGKey(0)
    kx, kw1, kb1, kw2, kb2 = jax.random.split(key, 5)
    x = jax.random.normal(kx, (B, C, D, H, W), dtype=jnp.float32)
    # Deterministic synthetic parameters (Conv3d 1x1x1 weights squeezed to 2D).
    w1 = jax.random.normal(kw1, (Cfc, C), dtype=jnp.float32) * 0.1
    b1 = jax.random.normal(kb1, (Cfc,), dtype=jnp.float32) * 0.1
    w2 = jax.random.normal(kw2, (C, Cfc), dtype=jnp.float32) * 0.1
    b2 = jax.random.normal(kb2, (C,), dtype=jnp.float32) * 0.1

    fwd = jax.jit(se_forward)
    out = jax.block_until_ready(fwd(x, w1, b1, w2, b2))

    ref = se_reference(x, w1, b1, w2, b2)
    assert out.shape == (B, C, D, H, W)
    tol = 1e-5 if x.dtype == jnp.float32 else 2e-2   # bf16 rounds at the final store
    assert jnp.max(jnp.abs(out - ref)) < tol

    print("KERNEL_OK")
</pallas_src>

<mosaic_0001>
module attributes {stable_mosaic.version = 11 : i64} {
  func.func @_se_fused_kernel(%arg0: i32, %arg1: memref<1x16x128xf32, #tpu.memory_space<vmem>>, %arg2: memref<8x16xf32, #tpu.memory_space<vmem>>, %arg3: memref<1x8xf32, #tpu.memory_space<vmem>>, %arg4: memref<16x8xf32, #tpu.memory_space<vmem>>, %arg5: memref<1x16xf32, #tpu.memory_space<vmem>>, %arg6: memref<1x16x128xf32, #tpu.memory_space<vmem>>) attributes {dimension_semantics = [#tpu.dimension_semantics<parallel>], iteration_bounds = array<i64: 2>, scalar_prefetch = 0 : i64, scratch_operands = 0 : i64, tpu.core_type = #tpu.core_type<tc>, window_params = [{transform_indices = @transform_0, window_bounds = array<i64: 1, 16, 128>}, {pipeline_mode = #tpu.pipeline_mode<synchronous>, transform_indices = @transform_1, window_bounds = array<i64: 8, 16>}, {pipeline_mode = #tpu.pipeline_mode<synchronous>, transform_indices = @transform_2, window_bounds = array<i64: 1, 8>}, {pipeline_mode = #tpu.pipeline_mode<synchronous>, transform_indices = @transform_3, window_bounds = array<i64: 16, 8>}, {pipeline_mode = #tpu.pipeline_mode<synchronous>, transform_indices = @transform_4, window_bounds = array<i64: 1, 16>}, {transform_indices = @transform_5, window_bounds = array<i64: 1, 16, 128>}]} {
    %c0 = arith.constant 0 : index
    %c0_0 = arith.constant 0 : index
    %c0_1 = arith.constant 0 : index
    %0 = vector.load %arg1[%c0, %c0_0, %c0_1] : memref<1x16x128xf32, #tpu.memory_space<vmem>>, vector<1x16x128xf32>
    %cst = arith.constant dense<0.000000e+00> : vector<1x16xf32>
    %1 = vector.multi_reduction <add>, %0, %cst [2] : vector<1x16x128xf32> to vector<1x16xf32>
    %cst_2 = arith.constant 7.812500e-03 : f32
    %2 = vector.broadcast %cst_2 : f32 to vector<1x16xf32>
    %3 = arith.mulf %1, %2 : vector<1x16xf32>
    %c0_3 = arith.constant 0 : index
    %c0_4 = arith.constant 0 : index
    %4 = vector.load %arg2[%c0_3, %c0_4] : memref<8x16xf32, #tpu.memory_space<vmem>>, vector<8x16xf32>
    %5 = vector.shape_cast %4 : vector<8x16xf32> to vector<1x8x16xf32>
    %6 = vector.shape_cast %3 : vector<1x16xf32> to vector<1x1x16xf32>
    %7 = vector.broadcast %6 : vector<1x1x16xf32> to vector<1x8x16xf32>
    %8 = arith.mulf %5, %7 : vector<1x8x16xf32>
    %cst_5 = arith.constant dense<0.000000e+00> : vector<1x8xf32>
    %9 = vector.multi_reduction <add>, %8, %cst_5 [2] : vector<1x8x16xf32> to vector<1x8xf32>
    %c0_6 = arith.constant 0 : index
    %c0_7 = arith.constant 0 : index
    %10 = vector.load %arg3[%c0_6, %c0_7] : memref<1x8xf32, #tpu.memory_space<vmem>>, vector<1x8xf32>
    %11 = arith.addf %9, %10 : vector<1x8xf32>
    %cst_8 = arith.constant 0.000000e+00 : f32
    %12 = vector.broadcast %cst_8 : f32 to vector<1x8xf32>
    %13 = arith.maximumf %11, %12 : vector<1x8xf32>
    %c0_9 = arith.constant 0 : index
    %c0_10 = arith.constant 0 : index
    %14 = vector.load %arg4[%c0_9, %c0_10] : memref<16x8xf32, #tpu.memory_space<vmem>>, vector<16x8xf32>
    %15 = vector.shape_cast %14 : vector<16x8xf32> to vector<1x16x8xf32>
    %16 = vector.shape_cast %13 : vector<1x8xf32> to vector<1x1x8xf32>
    %17 = vector.broadcast %16 : vector<1x1x8xf32> to vector<1x16x8xf32>
    %18 = arith.mulf %15, %17 : vector<1x16x8xf32>
    %cst_11 = arith.constant dense<0.000000e+00> : vector<1x16xf32>
    %19 = vector.multi_reduction <add>, %18, %cst_11 [2] : vector<1x16x8xf32> to vector<1x16xf32>
    %c0_12 = arith.constant 0 : index
    %c0_13 = arith.constant 0 : index
    %20 = vector.load %arg5[%c0_12, %c0_13] : memref<1x16xf32, #tpu.memory_space<vmem>>, vector<1x16xf32>
    %21 = arith.addf %19, %20 : vector<1x16xf32>
    %22 = arith.negf %21 : vector<1x16xf32>
    %23 = math.exp %22 : vector<1x16xf32>
    %cst_14 = arith.constant 1.000000e+00 : f32
    %24 = vector.broadcast %cst_14 : f32 to vector<1x16xf32>
    %25 = arith.addf %24, %23 : vector<1x16xf32>
    %26 = arith.divf %24, %25 : vector<1x16xf32>
    %c0_15 = arith.constant 0 : index
    %c0_16 = arith.constant 0 : index
    %c0_17 = arith.constant 0 : index
    %27 = vector.load %arg1[%c0_15, %c0_16, %c0_17] : memref<1x16x128xf32, #tpu.memory_space<vmem>>, vector<1x16x128xf32>
    %28 = vector.shape_cast %26 : vector<1x16xf32> to vector<1x16x1xf32>
    %29 = vector.broadcast %28 : vector<1x16x1xf32> to vector<1x16x128xf32>
    %30 = arith.mulf %27, %29 : vector<1x16x128xf32>
    %c0_18 = arith.constant 0 : index
    %c0_19 = arith.constant 0 : index
    %c0_20 = arith.constant 0 : index
    %31 = vector.load %arg6[%c0_18, %c0_19, %c0_20] : memref<1x16x128xf32, #tpu.memory_space<vmem>>, vector<1x16x128xf32>
    tpu.vector_store %arg6[%c0_18, %c0_19, %c0_20], %30 {strides = array<i32>} : memref<1x16x128xf32, #tpu.memory_space<vmem>>, vector<1x16x128xf32>,
    return
  }
  func.func @transform_0(%arg0: i32) -> (i32, i32, i32) {
    %c0_i32 = arith.constant 0 : i32
    %c0_i32_0 = arith.constant 0 : i32
    %c0_i32_1 = arith.constant 0 : i32
    return %arg0, %c0_i32, %c0_i32_0 : i32, i32, i32
  }
  func.func @transform_1(%arg0: i32) -> (i32, i32) {
    %c0_i32 = arith.constant 0 : i32
    %c0_i32_0 = arith.constant 0 : i32
    %c0_i32_1 = arith.constant 0 : i32
    return %c0_i32, %c0_i32_0 : i32, i32
  }
  func.func @transform_2(%arg0: i32) -> (i32, i32) {
    %c0_i32 = arith.constant 0 : i32
    %c0_i32_0 = arith.constant 0 : i32
    %c0_i32_1 = arith.constant 0 : i32
    return %c0_i32, %c0_i32_0 : i32, i32
  }
  func.func @transform_3(%arg0: i32) -> (i32, i32) {
    %c0_i32 = arith.constant 0 : i32
    %c0_i32_0 = arith.constant 0 : i32
    %c0_i32_1 = arith.constant 0 : i32
    return %c0_i32, %c0_i32_0 : i32, i32
  }
  func.func @transform_4(%arg0: i32) -> (i32, i32) {
    %c0_i32 = arith.constant 0 : i32
    %c0_i32_0 = arith.constant 0 : i32
    %c0_i32_1 = arith.constant 0 : i32
    return %c0_i32, %c0_i32_0 : i32, i32
  }
  func.func @transform_5(%arg0: i32) -> (i32, i32, i32) {
    %c0_i32 = arith.constant 0 : i32
    %c0_i32_0 = arith.constant 0 : i32
    %c0_i32_1 = arith.constant 0 : i32
    return %arg0, %c0_i32, %c0_i32_0 : i32, i32, i32
  }
}

</mosaic_0001>

<bundles_post_ra>
// kernel: se_forward.1
= control target key start
LH: loop header
LB: loop body
LE: loop exit
PB: predicated region body
PF: predicated region fallthrough
CT: control target
= control target key end

     0   :  { %s478_s18 = smov 0   ;;  %s525_s0 = inlined_call_operand.vmem [shape: f32[2,16,128], index: 0, kind: input, shape index: {}]   ;;  %s526_s1 = inlined_call_operand.vmem [shape: f32[8,16], index: 1, kind: input, shape index: {}]   ;;  %s527_s2 = inlined_call_operand.vmem [shape: f32[1,8], index: 2, kind: input, shape index: {}]   ;;  %s528_s3 = inlined_call_operand.vmem [shape: f32[16,8], index: 3, kind: input, shape index: {}]   ;;  %s529_s4 = inlined_call_operand.vmem [shape: f32[1,16], index: 4, kind: input, shape index: {}]   ;;  %s530_s5 = inlined_call_operand.vmem [shape: f32[2,16,128], index: 5, kind: output, shape index: {}]  }
   0x1 LB: > { %s403_s19 = sadd.s32 4294967295, %s445_s18   ;;  %p407_p0 = scmp.ge.s32.totalorder %s445_s18, 1  ;;  %s445_s18 = sphi %s478_s18, %s15_s18  }
   0x2   : > { %p187_p1 = scmp.lt.s32.totalorder %s445_s18, 3 }
   0x4   : > { %p188_p2 = pnand %p407_p0, %p187_p1 }
   0x5   : > { %p215_p3 = scmp.lt.s32.totalorder (!%p188_p2), %s403_s19, 1  ;;  %v236_v2 = vlaneseq (!%p188_p2)  ;;  %vm247_vm0 = vcmask (!%p188_p2), 130112   ;;  %v233_v14 = vld [vmem:[%s526_s1] sm:$0xff] (!%p188_p2)  ;;  %vm263_vm1 = vcmask (!%p188_p2), 130048   ;;  %v447_v19 = vmov (!%p188_p2), 0   ;;  %v280_v25 = vld [vmem:[%s528_s3 + $0x8] sm:$0xff] (!%p188_p2) }
   0x6   : > { %191 = sbr.rel (%p188_p2) target bundleno = 763 (0x2fb), region = 40  ;;  %v412_v18 = vld [vmem:[%s527_s2] ss:$0 sm:$0xff] (!%p188_p2)  ;;  %429 = vset.pattern.permute.xlu0 (!%p188_p2), %v447_v19  ;;  %430 = vset.pattern.permute.xlu1 (!%p188_p2), %v447_v19  ;;  %vm298_vm2 = vcmask (!%p188_p2), 64512  }
   0x7   : > { %v237_v3 = vand.u32 (!%p188_p2), 127, %v236_v2  ;;  %v239_v4 = vshrl.u32 (!%p188_p2), %v236_v2, 7  ;;  %v279_v26 = vld [vmem:[%s528_s3] sm:$0xff] (!%p188_p2) }
   0x8   : > { %v413_v32 = vld [vmem:[%s529_s4] ss:$0 sm:$0xff] (!%p188_p2) }
   0x9   : > { %v242_v5 = vadd.s32 (!%p188_p2), 4294967288, %v237_v3  ;;  %v240_v7 = vsub.s32 (!%p188_p2), %v237_v3, %v239_v4 }
   0xb   : > { %v245_v9 = vsub.s32 (!%p188_p2), %v242_v5, %v239_v4 }
   0xd   : > { %s532_s19 = smov (!%p215_p3, %s403_s19), 1 }
   0xe   : > { %s418_s20 = sshll.u32 %s532_s19, 4 }
   0xf   : > { %s219_s23 = scalar_lea.vmem %s525_s0, %s418_s20  ;;  %s224_s11 = scalar_lea.vmem %s530_s5, %s418_s20 }
  0x10   : > { %v494_v0 = vld [vmem:[%s219_s23] sm:$0xff]  ;;  %v497_v1 = vld [vmem:[%s219_s23 + $0x8] sm:$0xff] }
  0x11   : > { %227 = vadd.xlane.f32.xlu0 %v494_v0 }
  0x15   : > { %229 = vadd.xlane.f32.xlu0 %v497_v1 }
  0x9e   : > { %v228_v6 = vpop.xlane.xlu0 %227 }
  0x9f   : > { %v231_v8 = vmul.f32 0.0078125, %v228_v6 }
  0xa1   : > { %v241_v12 = vrot.slane %v231_v8, %v240_v7 }
  0xa2   : > { %v230_v10 = vpop.xlane.xlu0 %229 }
  0xa3   : > { %v232_v11 = vmul.f32 0.0078125, %v230_v10 }
  0xa5   : > { %v246_v13 = vrot.slane %v232_v11, %v245_v9 }
  0xa7   : > { %v248_v15 = vsel %vm247_vm0, %v246_v13, %v241_v12 }
  0xa8   : > { %v262_v16 = vmul.f32 %v248_v15, %v233_v14 }
  0xaa   : > { %v264_v17 = vsel %vm263_vm1, %v262_v16, 0.0 }
  0xab   : > { %265 = vadd.xlane.f32.xlu1 %v264_v17 }
  0xbc   : > { %274 = vbcast.lane.b32.xlu1 %v412_v18, 256 }
 0x138   : > { %v266_v20 = vpop.xlane.xlu1 %265 }
 0x13c   : > { %v275_v21 = vpop.permute.xlu1 %274 }
 0x13d   : > { %v277_v22 = vadd.f32 %v275_v21, %v266_v20 }
 0x13f   : > { %v278_v23 = vmax.f32 %v277_v22, 0.0 }
 0x141   : > { %283 = vperm.xlu0 %429, %v278_v23  }
 0x1c0   : > { %v284_v24 = vpop.permute.xlu0 %283 }
 0x1c1   : > { %v288_v27 = vrot.slane %v284_v24, %v240_v7 }
 0x1c3   : > { %v297_v28 = vmul.f32 %v288_v27, %v280_v25  ;;  %v296_v29 = vmul.f32 %v288_v27, %v279_v26 }
 0x1c5   : > { %v302_v30 = vsel %vm298_vm2, %v297_v28, 0.0  ;;  %v299_v31 = vsel %vm298_vm2, %v296_v29, 0.0 }
 0x1c6   : > { %303 = vadd.xlane.f32.xlu0 %v302_v30  ;;  %300 = vadd.xlane.f32.xlu1 %v299_v31 }
 0x1d7   : > { %312 = vbcast.lane.b32.xlu1 %v413_v32, 256 }
 0x1db   : > { %316 = vbcast.lane.b32.xlu1 %v413_v32, 264 }
 0x253   : > { %v301_v33 = vpop.xlane.xlu1 %300  ;;  %v304_v37 = vpop.xlane.xlu0 %303 }
 0x257   : > { %v313_v34 = vpop.permute.xlu1 %312 }
 0x258   : > { %v320_v35 = vadd.f32 %v313_v34, %v301_v33 }
 0x25a   : > { %v414_v36 = vmul.f32 -1.442695, %v320_v35 }
 0x25b   : > { %v317_v38 = vpop.permute.xlu1 %316 }
 0x25c   : > { %431 = vpow2.f32 %v414_v36  ;;  %v321_v39 = vadd.f32 %v317_v38, %v304_v37 }
 0x25e   : > { %v415_v40 = vmul.f32 -1.442695, %v321_v39 }
 0x260   : > { %433 = vpow2.f32 %v415_v40 }
 0x266   : > { %v432_v41 = vpop.eup %431 }
 0x267   : > { %v328_v42 = vadd.f32 1.0, %v432_v41 }
 0x269   : > { %435 = vrcp.f32 %v328_v42 }
 0x26a   : > { %v434_v43 = vpop.eup %433 }
 0x26b   : > { %v329_v44 = vadd.f32 1.0, %v434_v43 }
 0x26d   : > { %437 = vrcp.f32 %v329_v44 }
 0x273   : > { %v436_v45 = vpop.eup %435 }
 0x274   : > { %336 = vperm.xlu1 %430, %v436_v45  }
 0x277   : > { %v438_v46 = vpop.eup %437 }
 0x278   : > { %341 = vperm.xlu1 %430, %v438_v46  }
 0x2f3   : > { %v337_v47 = vpop.permute.xlu1 %336 }
 0x2f4   : > { %v344_v48 = vmul.f32 %v337_v47, %v494_v0 }
 0x2f6   : > { %346 = vst [vmem:[%s224_s11] sm:$0xff] %v344_v48 }
 0x2f7   : > { %v342_v49 = vpop.permute.xlu1 %341 }
 0x2f8   : > { %v345_v50 = vmul.f32 %v342_v49, %v497_v1 }
 0x2fa   : > { %347 = vst [vmem:[%s224_s11 + $0x8] sm:$0xff] %v345_v50 }
 0x2fb PF: > { %s15_s18 = sadd.s32 1, %s445_s18  }
 0x2fc   : > { %p12_p4 = scmp.ge.s32.totalorder %s15_s18, 4  }
 0x2fe   :  { %14 = sbr.rel (!%p12_p4) target bundleno = 1 (0x1), region = 70 }

</bundles_post_ra>
